<compile_context>
chip_gen: v6e
topology: v6e:2x2x1
jax: 0.10.0
libtpu: 0.0.40
codegen_flags: <defaults>
</compile_context>

<pallas_src>
import functools

import jax
import jax.numpy as jnp
from jax import lax
from jax.experimental import pallas as pl
from jax.experimental.pallas import tpu as pltpu


IN_F, H1_F, H2_F, OUT_F = 4, 16, 8, 2

LANE = 128      # lane granule
CHUNK = 512     # inner lane-chunk; keeps per-chunk intermediates in vregs


def _round_up(x, m):
    return (x + m - 1) // m * m


def _affine_t(x_t, w, b):
    """w @ x_t + b with x_t: [K, n], w: [M, K], b: [M, 1] -> [M, n].

    K, M <= 16, so a statically unrolled sequence of broadcast multiply-adds
    on the VPU beats pushing 4/16/8-wide operands through the MXU.  Two
    independent accumulation chains shorten the serial VALU dependency chain
    (on v5e each f32 MAC is 2 dependent ops).
    """
    m, k = w.shape
    n = x_t.shape[1]
    acc0 = jnp.broadcast_to(b, (m, n))
    acc1 = None
    for j in range(k):                       # static unroll, k <= 16
        term = w[:, j:j + 1] * x_t[j:j + 1, :]
        if j % 2 == 0:
            acc0 = acc0 + term
        else:
            acc1 = term if acc1 is None else acc1 + term
    return acc0 if acc1 is None else acc0 + acc1


def mlp_kernel(x_ref, w1_ref, b1_ref, w2_ref, b2_ref, w3_ref, b3_ref, o_ref,
               *, chunk):
    """One batch tile: x_ref [4, TB] -> o_ref [2, TB], chunked over lanes."""
    w1, b1 = w1_ref[...], b1_ref[...]
    w2, b2 = w2_ref[...], b2_ref[...]
    w3, b3 = w3_ref[...], b3_ref[...]

    n_chunks = x_ref.shape[1] // chunk       # static; chunk divides TB

    def body(c, carry):
        off = pl.multiple_of(c * chunk, chunk)           # chunk % 128 == 0
        xt = x_ref[:, pl.ds(off, chunk)]                              # [4,  C]
        h1 = jnp.maximum(_affine_t(xt, w1, b1), 0.0)                  # [16, C]
        h2 = jnp.maximum(_affine_t(h1, w2, b2), 0.0)                  # [8,  C]
        o_ref[:, pl.ds(off, chunk)] = _affine_t(h2, w3, b3).astype(o_ref.dtype)
        return carry

    lax.fori_loop(0, n_chunks, body, 0, unroll=True)


def _choose_tile(B, tile_b):
    """Pick the lane-dense batch tile.

    Rules: multiple of 128 (lane constraint) and of CHUNK when larger than
    CHUNK (so the inner chunk loop is exact); as large as tile_b to amortize
    per-grid-step overhead; but small enough that the grid has >= 2 steps
    whenever B allows it, so v7x's two TensorCores both get work.
    """
    tile_b = max(CHUNK, _round_up(int(tile_b), CHUNK))   # guard odd tile_b
    bp = _round_up(B, LANE)
    if bp <= LANE:
        return LANE                                      # can't split further
    half = _round_up(pl.cdiv(bp, 2), LANE)               # >= 2 grid steps
    tb = min(tile_b, half)
    if tb > CHUNK:
        tb = _round_up(tb, CHUNK)
    return tb


@functools.partial(jax.jit, static_argnames=("tile_b",))
def simple_nn_forward(x, params, *, tile_b=8192):
    """x: [B, 4] float32 -> [B, 2] float32 (== PyTorch SimpleNN.forward)."""
    w1, b1, w2, b2, w3, b3 = params          # weight [out, in], bias [out, 1]
    B = x.shape[0]

    tb = _choose_tile(B, tile_b)
    chunk = min(CHUNK, tb)
    grid = (pl.cdiv(B, tb),)                 # partial last block, no jnp.pad

    x_t = x.T                                # [4, B] batch-in-lanes relayout

    x_spec = pl.BlockSpec((IN_F, tb), lambda i: (0, i))
    out_spec = pl.BlockSpec((OUT_F, tb), lambda i: (0, i))
    # Constant index_map + full-extent blocks => weights stay resident in VMEM.
    const = lambda i: (0, 0)
    w_specs = [
        pl.BlockSpec((H1_F, IN_F), const), pl.BlockSpec((H1_F, 1), const),
        pl.BlockSpec((H2_F, H1_F), const), pl.BlockSpec((H2_F, 1), const),
        pl.BlockSpec((OUT_F, H2_F), const), pl.BlockSpec((OUT_F, 1), const),
    ]

    param_bytes = 4 * (H1_F * IN_F + H1_F + H2_F * H1_F + H2_F
                       + OUT_F * H2_F + OUT_F)
    cost = pl.CostEstimate(
        flops=2 * B * (IN_F * H1_F + H1_F * H2_F + H2_F * OUT_F),
        transcendentals=0,
        bytes_accessed=B * 4 * (IN_F + OUT_F) + param_bytes,
    )

    out_t = pl.pallas_call(
        functools.partial(mlp_kernel, chunk=chunk),
        out_shape=jax.ShapeDtypeStruct((OUT_F, B), jnp.float32),
        grid=grid,
        in_specs=[x_spec] + w_specs,
        out_specs=out_spec,
        compiler_params=pltpu.CompilerParams(dimension_semantics=("parallel",)),
        cost_estimate=cost,
    )(x_t, w1, b1, w2, b2, w3, b3)

    return out_t.T                           # [B, 2]


def init_params(key):
    """Deterministic params.

    Layout: weight [out, in] (PyTorch nn.Linear layout), bias [out, 1].
    NOTE: PyTorch stores bias as [out]; add a [:, None] when importing a real
    state_dict.
    """
    k1, k2, k3, k4, k5, k6 = jax.random.split(key, 6)
    w1 = jax.random.normal(k1, (H1_F, IN_F), jnp.float32) * 0.1
    b1 = jax.random.normal(k2, (H1_F, 1), jnp.float32) * 0.01
    w2 = jax.random.normal(k3, (H2_F, H1_F), jnp.float32) * 0.1
    b2 = jax.random.normal(k4, (H2_F, 1), jnp.float32) * 0.01
    w3 = jax.random.normal(k5, (OUT_F, H2_F), jnp.float32) * 0.1
    b3 = jax.random.normal(k6, (OUT_F, 1), jnp.float32) * 0.01
    return (w1, b1, w2, b2, w3, b3)


def reference_forward(x, params):
    """Pure-JAX reference with identical semantics (sanity check)."""
    w1, b1, w2, b2, w3, b3 = params
    h1 = jnp.maximum(x @ w1.T + b1[:, 0], 0.0)
    h2 = jnp.maximum(h1 @ w2.T + b2[:, 0], 0.0)
    return h2 @ w3.T + b3[:, 0]


if __name__ == "__main__":
    key = jax.random.PRNGKey(0)
    pkey, xkey = jax.random.split(key)
    params = init_params(pkey)

    # B=1000: 2-step grid, single-chunk tiles, partial (488-wide) last block.
    # B=2500: 2-step grid, multi-chunk tiles (tb=1536, 3 chunks), partial tail.
    for B in (1000, 2500):
        x = jax.random.normal(jax.random.fold_in(xkey, B), (B, IN_F), jnp.float32)
        out = jax.block_until_ready(simple_nn_forward(x, params))
        ref = reference_forward(x, params)
        assert out.shape == (B, OUT_F)
        assert jnp.allclose(out, ref, atol=1e-5, rtol=1e-5), f"mismatch at B={B}"

    print("KERNEL_OK")
</pallas_src>

<mosaic_0001>
module attributes {stable_mosaic.version = 11 : i64} {
  func.func @mlp_kernel(%arg0: i32, %arg1: memref<4x512xf32, #tpu.memory_space<vmem>>, %arg2: memref<16x4xf32, #tpu.memory_space<vmem>>, %arg3: memref<16x1xf32, #tpu.memory_space<vmem>>, %arg4: memref<8x16xf32, #tpu.memory_space<vmem>>, %arg5: memref<8x1xf32, #tpu.memory_space<vmem>>, %arg6: memref<2x8xf32, #tpu.memory_space<vmem>>, %arg7: memref<2x1xf32, #tpu.memory_space<vmem>>, %arg8: memref<2x512xf32, #tpu.memory_space<vmem>>) attributes {dimension_semantics = [#tpu.dimension_semantics<parallel>], iteration_bounds = array<i64: 2>, scalar_prefetch = 0 : i64, scratch_operands = 0 : i64, tpu.core_type = #tpu.core_type<tc>, window_params = [{transform_indices = @transform_0, window_bounds = array<i64: 4, 512>}, {pipeline_mode = #tpu.pipeline_mode<synchronous>, transform_indices = @transform_1, window_bounds = array<i64: 16, 4>}, {pipeline_mode = #tpu.pipeline_mode<synchronous>, transform_indices = @transform_2, window_bounds = array<i64: 16, 1>}, {pipeline_mode = #tpu.pipeline_mode<synchronous>, transform_indices = @transform_3, window_bounds = array<i64: 8, 16>}, {pipeline_mode = #tpu.pipeline_mode<synchronous>, transform_indices = @transform_4, window_bounds = array<i64: 8, 1>}, {pipeline_mode = #tpu.pipeline_mode<synchronous>, transform_indices = @transform_5, window_bounds = array<i64: 2, 8>}, {pipeline_mode = #tpu.pipeline_mode<synchronous>, transform_indices = @transform_6, window_bounds = array<i64: 2, 1>}, {transform_indices = @transform_7, window_bounds = array<i64: 2, 512>}]} {
    %c0 = arith.constant 0 : index
    %c0_0 = arith.constant 0 : index
    %0 = vector.load %arg2[%c0, %c0_0] : memref<16x4xf32, #tpu.memory_space<vmem>>, vector<16x4xf32>
    %c0_1 = arith.constant 0 : index
    %c0_2 = arith.constant 0 : index
    %1 = vector.load %arg3[%c0_1, %c0_2] : memref<16x1xf32, #tpu.memory_space<vmem>>, vector<16x1xf32>
    %c0_3 = arith.constant 0 : index
    %c0_4 = arith.constant 0 : index
    %2 = vector.load %arg4[%c0_3, %c0_4] : memref<8x16xf32, #tpu.memory_space<vmem>>, vector<8x16xf32>
    %c0_5 = arith.constant 0 : index
    %c0_6 = arith.constant 0 : index
    %3 = vector.load %arg5[%c0_5, %c0_6] : memref<8x1xf32, #tpu.memory_space<vmem>>, vector<8x1xf32>
    %c0_7 = arith.constant 0 : index
    %c0_8 = arith.constant 0 : index
    %4 = vector.load %arg6[%c0_7, %c0_8] : memref<2x8xf32, #tpu.memory_space<vmem>>, vector<2x8xf32>
    %c0_9 = arith.constant 0 : index
    %c0_10 = arith.constant 0 : index
    %5 = vector.load %arg7[%c0_9, %c0_10] : memref<2x1xf32, #tpu.memory_space<vmem>>, vector<2x1xf32>
    %c0_i32 = arith.constant 0 : i32
    %c512_i32 = arith.constant 512 : i32
    %6 = arith.muli %c0_i32, %c512_i32 : i32
    %7 = tpu.assume_multiple %6, 512 : i32
    %c0_11 = arith.constant 0 : index
    %8 = arith.index_cast %7 : i32 to index
    %9 = vector.load %arg1[%c0_11, %8] : memref<4x512xf32, #tpu.memory_space<vmem>>, vector<4x512xf32>
    %10 = vector.shape_cast %1 : vector<16x1xf32> to vector<16x1xf32>
    %11 = vector.broadcast %10 : vector<16x1xf32> to vector<16x512xf32>
    %12 = vector.extract_strided_slice %0 {offsets = [0, 0], sizes = [16, 1], strides = [1, 1]} : vector<16x4xf32> to vector<16x1xf32>
    %13 = vector.extract_strided_slice %9 {offsets = [0, 0], sizes = [1, 512], strides = [1, 1]} : vector<4x512xf32> to vector<1x512xf32>
    %14 = vector.broadcast %12 : vector<16x1xf32> to vector<16x512xf32>
    %15 = vector.broadcast %13 : vector<1x512xf32> to vector<16x512xf32>
    %16 = arith.mulf %14, %15 : vector<16x512xf32>
    %17 = arith.addf %11, %16 : vector<16x512xf32>
    %18 = vector.extract_strided_slice %0 {offsets = [0, 1], sizes = [16, 1], strides = [1, 1]} : vector<16x4xf32> to vector<16x1xf32>
    %19 = vector.extract_strided_slice %9 {offsets = [1, 0], sizes = [1, 512], strides = [1, 1]} : vector<4x512xf32> to vector<1x512xf32>
    %20 = vector.broadcast %18 : vector<16x1xf32> to vector<16x512xf32>
    %21 = vector.broadcast %19 : vector<1x512xf32> to vector<16x512xf32>
    %22 = arith.mulf %20, %21 : vector<16x512xf32>
    %23 = vector.extract_strided_slice %0 {offsets = [0, 2], sizes = [16, 1], strides = [1, 1]} : vector<16x4xf32> to vector<16x1xf32>
    %24 = vector.extract_strided_slice %9 {offsets = [2, 0], sizes = [1, 512], strides = [1, 1]} : vector<4x512xf32> to vector<1x512xf32>
    %25 = vector.broadcast %23 : vector<16x1xf32> to vector<16x512xf32>
    %26 = vector.broadcast %24 : vector<1x512xf32> to vector<16x512xf32>
    %27 = arith.mulf %25, %26 : vector<16x512xf32>
    %28 = arith.addf %17, %27 : vector<16x512xf32>
    %29 = vector.extract_strided_slice %0 {offsets = [0, 3], sizes = [16, 1], strides = [1, 1]} : vector<16x4xf32> to vector<16x1xf32>
    %30 = vector.extract_strided_slice %9 {offsets = [3, 0], sizes = [1, 512], strides = [1, 1]} : vector<4x512xf32> to vector<1x512xf32>
    %31 = vector.broadcast %29 : vector<16x1xf32> to vector<16x512xf32>
    %32 = vector.broadcast %30 : vector<1x512xf32> to vector<16x512xf32>
    %33 = arith.mulf %31, %32 : vector<16x512xf32>
    %34 = arith.addf %22, %33 : vector<16x512xf32>
    %35 = arith.addf %28, %34 : vector<16x512xf32>
    %cst = arith.constant 0.000000e+00 : f32
    %36 = vector.broadcast %cst : f32 to vector<16x512xf32>
    %37 = arith.maximumf %35, %36 : vector<16x512xf32>
    %38 = vector.shape_cast %3 : vector<8x1xf32> to vector<8x1xf32>
    %39 = vector.broadcast %38 : vector<8x1xf32> to vector<8x512xf32>
    %40 = vector.extract_strided_slice %2 {offsets = [0, 0], sizes = [8, 1], strides = [1, 1]} : vector<8x16xf32> to vector<8x1xf32>
    %41 = vector.extract_strided_slice %37 {offsets = [0, 0], sizes = [1, 512], strides = [1, 1]} : vector<16x512xf32> to vector<1x512xf32>
    %42 = vector.broadcast %40 : vector<8x1xf32> to vector<8x512xf32>
    %43 = vector.broadcast %41 : vector<1x512xf32> to vector<8x512xf32>
    %44 = arith.mulf %42, %43 : vector<8x512xf32>
    %45 = arith.addf %39, %44 : vector<8x512xf32>
    %46 = vector.extract_strided_slice %2 {offsets = [0, 1], sizes = [8, 1], strides = [1, 1]} : vector<8x16xf32> to vector<8x1xf32>
    %47 = vector.extract_strided_slice %37 {offsets = [1, 0], sizes = [1, 512], strides = [1, 1]} : vector<16x512xf32> to vector<1x512xf32>
    %48 = vector.broadcast %46 : vector<8x1xf32> to vector<8x512xf32>
    %49 = vector.broadcast %47 : vector<1x512xf32> to vector<8x512xf32>
    %50 = arith.mulf %48, %49 : vector<8x512xf32>
    %51 = vector.extract_strided_slice %2 {offsets = [0, 2], sizes = [8, 1], strides = [1, 1]} : vector<8x16xf32> to vector<8x1xf32>
    %52 = vector.extract_strided_slice %37 {offsets = [2, 0], sizes = [1, 512], strides = [1, 1]} : vector<16x512xf32> to vector<1x512xf32>
    %53 = vector.broadcast %51 : vector<8x1xf32> to vector<8x512xf32>
    %54 = vector.broadcast %52 : vector<1x512xf32> to vector<8x512xf32>
    %55 = arith.mulf %53, %54 : vector<8x512xf32>
    %56 = arith.addf %45, %55 : vector<8x512xf32>
    %57 = vector.extract_strided_slice %2 {offsets = [0, 3], sizes = [8, 1], strides = [1, 1]} : vector<8x16xf32> to vector<8x1xf32>
    %58 = vector.extract_strided_slice %37 {offsets = [3, 0], sizes = [1, 512], strides = [1, 1]} : vector<16x512xf32> to vector<1x512xf32>
    %59 = vector.broadcast %57 : vector<8x1xf32> to vector<8x512xf32>
    %60 = vector.broadcast %58 : vector<1x512xf32> to vector<8x512xf32>
    %61 = arith.mulf %59, %60 : vector<8x512xf32>
    %62 = arith.addf %50, %61 : vector<8x512xf32>
    %63 = vector.extract_strided_slice %2 {offsets = [0, 4], sizes = [8, 1], strides = [1, 1]} : vector<8x16xf32> to vector<8x1xf32>
    %64 = vector.extract_strided_slice %37 {offsets = [4, 0], sizes = [1, 512], strides = [1, 1]} : vector<16x512xf32> to vector<1x512xf32>
    %65 = vector.broadcast %63 : vector<8x1xf32> to vector<8x512xf32>
    %66 = vector.broadcast %64 : vector<1x512xf32> to vector<8x512xf32>
    %67 = arith.mulf %65, %66 : vector<8x512xf32>
    %68 = arith.addf %56, %67 : vector<8x512xf32>
    %69 = vector.extract_strided_slice %2 {offsets = [0, 5], sizes = [8, 1], strides = [1, 1]} : vector<8x16xf32> to vector<8x1xf32>
    %70 = vector.extract_strided_slice %37 {offsets = [5, 0], sizes = [1, 512], strides = [1, 1]} : vector<16x512xf32> to vector<1x512xf32>
    %71 = vector.broadcast %69 : vector<8x1xf32> to vector<8x512xf32>
    %72 = vector.broadcast %70 : vector<1x512xf32> to vector<8x512xf32>
    %73 = arith.mulf %71, %72 : vector<8x512xf32>
    %74 = arith.addf %62, %73 : vector<8x512xf32>
    %75 = vector.extract_strided_slice %2 {offsets = [0, 6], sizes = [8, 1], strides = [1, 1]} : vector<8x16xf32> to vector<8x1xf32>
    %76 = vector.extract_strided_slice %37 {offsets = [6, 0], sizes = [1, 512], strides = [1, 1]} : vector<16x512xf32> to vector<1x512xf32>
    %77 = vector.broadcast %75 : vector<8x1xf32> to vector<8x512xf32>
    %78 = vector.broadcast %76 : vector<1x512xf32> to vector<8x512xf32>
    %79 = arith.mulf %77, %78 : vector<8x512xf32>
    %80 = arith.addf %68, %79 : vector<8x512xf32>
    %81 = vector.extract_strided_slice %2 {offsets = [0, 7], sizes = [8, 1], strides = [1, 1]} : vector<8x16xf32> to vector<8x1xf32>
    %82 = vector.extract_strided_slice %37 {offsets = [7, 0], sizes = [1, 512], strides = [1, 1]} : vector<16x512xf32> to vector<1x512xf32>
    %83 = vector.broadcast %81 : vector<8x1xf32> to vector<8x512xf32>
    %84 = vector.broadcast %82 : vector<1x512xf32> to vector<8x512xf32>
    %85 = arith.mulf %83, %84 : vector<8x512xf32>
    %86 = arith.addf %74, %85 : vector<8x512xf32>
    %87 = vector.extract_strided_slice %2 {offsets = [0, 8], sizes = [8, 1], strides = [1, 1]} : vector<8x16xf32> to vector<8x1xf32>
    %88 = vector.extract_strided_slice %37 {offsets = [8, 0], sizes = [1, 512], strides = [1, 1]} : vector<16x512xf32> to vector<1x512xf32>
    %89 = vector.broadcast %87 : vector<8x1xf32> to vector<8x512xf32>
    %90 = vector.broadcast %88 : vector<1x512xf32> to vector<8x512xf32>
    %91 = arith.mulf %89, %90 : vector<8x512xf32>
    %92 = arith.addf %80, %91 : vector<8x512xf32>
    %93 = vector.extract_strided_slice %2 {offsets = [0, 9], sizes = [8, 1], strides = [1, 1]} : vector<8x16xf32> to vector<8x1xf32>
    %94 = vector.extract_strided_slice %37 {offsets = [9, 0], sizes = [1, 512], strides = [1, 1]} : vector<16x512xf32> to vector<1x512xf32>
    %95 = vector.broadcast %93 : vector<8x1xf32> to vector<8x512xf32>
    %96 = vector.broadcast %94 : vector<1x512xf32> to vector<8x512xf32>
    %97 = arith.mulf %95, %96 : vector<8x512xf32>
    %98 = arith.addf %86, %97 : vector<8x512xf32>
    %99 = vector.extract_strided_slice %2 {offsets = [0, 10], sizes = [8, 1], strides = [1, 1]} : vector<8x16xf32> to vector<8x1xf32>
    %100 = vector.extract_strided_slice %37 {offsets = [10, 0], sizes = [1, 512], strides = [1, 1]} : vector<16x512xf32> to vector<1x512xf32>
    %101 = vector.broadcast %99 : vector<8x1xf32> to vector<8x512xf32>
    %102 = vector.broadcast %100 : vector<1x512xf32> to vector<8x512xf32>
    %103 = arith.mulf %101, %102 : vector<8x512xf32>
    %104 = arith.addf %92, %103 : vector<8x512xf32>
    %105 = vector.extract_strided_slice %2 {offsets = [0, 11], sizes = [8, 1], strides = [1, 1]} : vector<8x16xf32> to vector<8x1xf32>
    %106 = vector.extract_strided_slice %37 {offsets = [11, 0], sizes = [1, 512], strides = [1, 1]} : vector<16x512xf32> to vector<1x512xf32>
    %107 = vector.broadcast %105 : vector<8x1xf32> to vector<8x512xf32>
    %108 = vector.broadcast %106 : vector<1x512xf32> to vector<8x512xf32>
    %109 = arith.mulf %107, %108 : vector<8x512xf32>
    %110 = arith.addf %98, %109 : vector<8x512xf32>
    %111 = vector.extract_strided_slice %2 {offsets = [0, 12], sizes = [8, 1], strides = [1, 1]} : vector<8x16xf32> to vector<8x1xf32>
    %112 = vector.extract_strided_slice %37 {offsets = [12, 0], sizes = [1, 512], strides = [1, 1]} : vector<16x512xf32> to vector<1x512xf32>
    %113 = vector.broadcast %111 : vector<8x1xf32> to vector<8x512xf32>
    %114 = vector.broadcast %112 : vector<1x512xf32> to vector<8x512xf32>
    %115 = arith.mulf %113, %114 : vector<8x512xf32>
    %116 = arith.addf %104, %115 : vector<8x512xf32>
    %117 = vector.extract_strided_slice %2 {offsets = [0, 13], sizes = [8, 1], strides = [1, 1]} : vector<8x16xf32> to vector<8x1xf32>
    %118 = vector.extract_strided_slice %37 {offsets = [13, 0], sizes = [1, 512], strides = [1, 1]} : vector<16x512xf32> to vector<1x512xf32>
    %119 = vector.broadcast %117 : vector<8x1xf32> to vector<8x512xf32>
    %120 = vector.broadcast %118 : vector<1x512xf32> to vector<8x512xf32>
    %121 = arith.mulf %119, %120 : vector<8x512xf32>
    %122 = arith.addf %110, %121 : vector<8x512xf32>
    %123 = vector.extract_strided_slice %2 {offsets = [0, 14], sizes = [8, 1], strides = [1, 1]} : vector<8x16xf32> to vector<8x1xf32>
    %124 = vector.extract_strided_slice %37 {offsets = [14, 0], sizes = [1, 512], strides = [1, 1]} : vector<16x512xf32> to vector<1x512xf32>
    %125 = vector.broadcast %123 : vector<8x1xf32> to vector<8x512xf32>
    %126 = vector.broadcast %124 : vector<1x512xf32> to vector<8x512xf32>
    %127 = arith.mulf %125, %126 : vector<8x512xf32>
    %128 = arith.addf %116, %127 : vector<8x512xf32>
    %129 = vector.extract_strided_slice %2 {offsets = [0, 15], sizes = [8, 1], strides = [1, 1]} : vector<8x16xf32> to vector<8x1xf32>
    %130 = vector.extract_strided_slice %37 {offsets = [15, 0], sizes = [1, 512], strides = [1, 1]} : vector<16x512xf32> to vector<1x512xf32>
    %131 = vector.broadcast %129 : vector<8x1xf32> to vector<8x512xf32>
    %132 = vector.broadcast %130 : vector<1x512xf32> to vector<8x512xf32>
    %133 = arith.mulf %131, %132 : vector<8x512xf32>
    %134 = arith.addf %122, %133 : vector<8x512xf32>
    %135 = arith.addf %128, %134 : vector<8x512xf32>
    %cst_12 = arith.constant 0.000000e+00 : f32
    %136 = vector.broadcast %cst_12 : f32 to vector<8x512xf32>
    %137 = arith.maximumf %135, %136 : vector<8x512xf32>
    %138 = vector.shape_cast %5 : vector<2x1xf32> to vector<2x1xf32>
    %139 = vector.broadcast %138 : vector<2x1xf32> to vector<2x512xf32>
    %140 = vector.extract_strided_slice %4 {offsets = [0, 0], sizes = [2, 1], strides = [1, 1]} : vector<2x8xf32> to vector<2x1xf32>
    %141 = vector.extract_strided_slice %137 {offsets = [0, 0], sizes = [1, 512], strides = [1, 1]} : vector<8x512xf32> to vector<1x512xf32>
    %142 = vector.broadcast %140 : vector<2x1xf32> to vector<2x512xf32>
    %143 = vector.broadcast %141 : vector<1x512xf32> to vector<2x512xf32>
    %144 = arith.mulf %142, %143 : vector<2x512xf32>
    %145 = arith.addf %139, %144 : vector<2x512xf32>
    %146 = vector.extract_strided_slice %4 {offsets = [0, 1], sizes = [2, 1], strides = [1, 1]} : vector<2x8xf32> to vector<2x1xf32>
    %147 = vector.extract_strided_slice %137 {offsets = [1, 0], sizes = [1, 512], strides = [1, 1]} : vector<8x512xf32> to vector<1x512xf32>
    %148 = vector.broadcast %146 : vector<2x1xf32> to vector<2x512xf32>
    %149 = vector.broadcast %147 : vector<1x512xf32> to vector<2x512xf32>
    %150 = arith.mulf %148, %149 : vector<2x512xf32>
    %151 = vector.extract_strided_slice %4 {offsets = [0, 2], sizes = [2, 1], strides = [1, 1]} : vector<2x8xf32> to vector<2x1xf32>
    %152 = vector.extract_strided_slice %137 {offsets = [2, 0], sizes = [1, 512], strides = [1, 1]} : vector<8x512xf32> to vector<1x512xf32>
    %153 = vector.broadcast %151 : vector<2x1xf32> to vector<2x512xf32>
    %154 = vector.broadcast %152 : vector<1x512xf32> to vector<2x512xf32>
    %155 = arith.mulf %153, %154 : vector<2x512xf32>
    %156 = arith.addf %145, %155 : vector<2x512xf32>
    %157 = vector.extract_strided_slice %4 {offsets = [0, 3], sizes = [2, 1], strides = [1, 1]} : vector<2x8xf32> to vector<2x1xf32>
    %158 = vector.extract_strided_slice %137 {offsets = [3, 0], sizes = [1, 512], strides = [1, 1]} : vector<8x512xf32> to vector<1x512xf32>
    %159 = vector.broadcast %157 : vector<2x1xf32> to vector<2x512xf32>
    %160 = vector.broadcast %158 : vector<1x512xf32> to vector<2x512xf32>
    %161 = arith.mulf %159, %160 : vector<2x512xf32>
    %162 = arith.addf %150, %161 : vector<2x512xf32>
    %163 = vector.extract_strided_slice %4 {offsets = [0, 4], sizes = [2, 1], strides = [1, 1]} : vector<2x8xf32> to vector<2x1xf32>
    %164 = vector.extract_strided_slice %137 {offsets = [4, 0], sizes = [1, 512], strides = [1, 1]} : vector<8x512xf32> to vector<1x512xf32>
    %165 = vector.broadcast %163 : vector<2x1xf32> to vector<2x512xf32>
    %166 = vector.broadcast %164 : vector<1x512xf32> to vector<2x512xf32>
    %167 = arith.mulf %165, %166 : vector<2x512xf32>
    %168 = arith.addf %156, %167 : vector<2x512xf32>
    %169 = vector.extract_strided_slice %4 {offsets = [0, 5], sizes = [2, 1], strides = [1, 1]} : vector<2x8xf32> to vector<2x1xf32>
    %170 = vector.extract_strided_slice %137 {offsets = [5, 0], sizes = [1, 512], strides = [1, 1]} : vector<8x512xf32> to vector<1x512xf32>
    %171 = vector.broadcast %169 : vector<2x1xf32> to vector<2x512xf32>
    %172 = vector.broadcast %170 : vector<1x512xf32> to vector<2x512xf32>
    %173 = arith.mulf %171, %172 : vector<2x512xf32>
    %174 = arith.addf %162, %173 : vector<2x512xf32>
    %175 = vector.extract_strided_slice %4 {offsets = [0, 6], sizes = [2, 1], strides = [1, 1]} : vector<2x8xf32> to vector<2x1xf32>
    %176 = vector.extract_strided_slice %137 {offsets = [6, 0], sizes = [1, 512], strides = [1, 1]} : vector<8x512xf32> to vector<1x512xf32>
    %177 = vector.broadcast %175 : vector<2x1xf32> to vector<2x512xf32>
    %178 = vector.broadcast %176 : vector<1x512xf32> to vector<2x512xf32>
    %179 = arith.mulf %177, %178 : vector<2x512xf32>
    %180 = arith.addf %168, %179 : vector<2x512xf32>
    %181 = vector.extract_strided_slice %4 {offsets = [0, 7], sizes = [2, 1], strides = [1, 1]} : vector<2x8xf32> to vector<2x1xf32>
    %182 = vector.extract_strided_slice %137 {offsets = [7, 0], sizes = [1, 512], strides = [1, 1]} : vector<8x512xf32> to vector<1x512xf32>
    %183 = vector.broadcast %181 : vector<2x1xf32> to vector<2x512xf32>
    %184 = vector.broadcast %182 : vector<1x512xf32> to vector<2x512xf32>
    %185 = arith.mulf %183, %184 : vector<2x512xf32>
    %186 = arith.addf %174, %185 : vector<2x512xf32>
    %187 = arith.addf %180, %186 : vector<2x512xf32>
    %c0_13 = arith.constant 0 : index
    %188 = arith.index_cast %7 : i32 to index
    %189 = vector.load %arg8[%c0_13, %188] : memref<2x512xf32, #tpu.memory_space<vmem>>, vector<2x512xf32>
    tpu.vector_store %arg8[%c0_13, %188], %187 {strides = array<i32>} : memref<2x512xf32, #tpu.memory_space<vmem>>, vector<2x512xf32>,
    %c1_i32 = arith.constant 1 : i32
    return
  }
  func.func @transform_0(%arg0: i32) -> (i32, i32) {
    %c0_i32 = arith.constant 0 : i32
    %c0_i32_0 = arith.constant 0 : i32
    return %c0_i32, %arg0 : i32, i32
  }
  func.func @transform_1(%arg0: i32) -> (i32, i32) {
    %c0_i32 = arith.constant 0 : i32
    %c0_i32_0 = arith.constant 0 : i32
    %c0_i32_1 = arith.constant 0 : i32
    return %c0_i32, %c0_i32_0 : i32, i32
  }
  func.func @transform_2(%arg0: i32) -> (i32, i32) {
    %c0_i32 = arith.constant 0 : i32
    %c0_i32_0 = arith.constant 0 : i32
    %c0_i32_1 = arith.constant 0 : i32
    return %c0_i32, %c0_i32_0 : i32, i32
  }
  func.func @transform_3(%arg0: i32) -> (i32, i32) {
    %c0_i32 = arith.constant 0 : i32
    %c0_i32_0 = arith.constant 0 : i32
    %c0_i32_1 = arith.constant 0 : i32
    return %c0_i32, %c0_i32_0 : i32, i32
  }
  func.func @transform_4(%arg0: i32) -> (i32, i32) {
    %c0_i32 = arith.constant 0 : i32
    %c0_i32_0 = arith.constant 0 : i32
    %c0_i32_1 = arith.constant 0 : i32
    return %c0_i32, %c0_i32_0 : i32, i32
  }
  func.func @transform_5(%arg0: i32) -> (i32, i32) {
    %c0_i32 = arith.constant 0 : i32
    %c0_i32_0 = arith.constant 0 : i32
    %c0_i32_1 = arith.constant 0 : i32
    return %c0_i32, %c0_i32_0 : i32, i32
  }
  func.func @transform_6(%arg0: i32) -> (i32, i32) {
    %c0_i32 = arith.constant 0 : i32
    %c0_i32_0 = arith.constant 0 : i32
    %c0_i32_1 = arith.constant 0 : i32
    return %c0_i32, %c0_i32_0 : i32, i32
  }
  func.func @transform_7(%arg0: i32) -> (i32, i32) {
    %c0_i32 = arith.constant 0 : i32
    %c0_i32_0 = arith.constant 0 : i32
    return %c0_i32, %arg0 : i32, i32
  }
}

</mosaic_0001>

<bundles_post_ra>
// kernel: simple_nn_forward.1
= control target key start
LH: loop header
LB: loop body
LE: loop exit
PB: predicated region body
PF: predicated region fallthrough
CT: control target
= control target key end

     0   :  { %12 = vsyncpa [#allocation3], 0  ;;  %s2019_s0 = inlined_call_operand.vmem [shape: f32[4,1000], index: 0, kind: input, shape index: {}]   ;;  %s2020_s1 = inlined_call_operand.vmem [shape: f32[16,4], index: 1, kind: input, shape index: {}]   ;;  %s2021_s2 = inlined_call_operand.vmem [shape: f32[16,1], index: 2, kind: input, shape index: {}]   ;;  %s2022_s3 = inlined_call_operand.vmem [shape: f32[8,16], index: 3, kind: input, shape index: {}]   ;;  %s2023_s4 = inlined_call_operand.vmem [shape: f32[8,1], index: 4, kind: input, shape index: {}]   ;;  %s2024_s5 = inlined_call_operand.vmem [shape: f32[2,8], index: 5, kind: input, shape index: {}]   ;;  %s2025_s6 = inlined_call_operand.vmem [shape: f32[2,1], index: 6, kind: input, shape index: {}]   ;;  %s2026_s7 = inlined_call_operand.hbm [shape: f32[2,1000], index: 7, kind: output, shape index: {}]  }
   0x1   :  { %14 = vsyncpa [#allocation3 + $0x1], 0  ;;  %s1559_s24 = smov 0   ;;  %s1561_s25 = smov 0  }
   0x2   :  { %s1563_s26 = smov 0   ;;  %s1565_s27 = smov 0  }
   0x3 LB: > { %s1580_s28 = sadd.s32 4294967295, %s1499_s27   ;;  %s1337_s29 = sadd.s32 4294967294, %s1499_s27   ;;  %s1499_s27 = sphi %s1565_s27, %s2055_s27   ;;  %s1495_s26 = sphi %s1563_s26, %s2054_s26   ;;  %s1491_s25 = sphi %s1561_s25, %s2053_s25   ;;  %s1487_s24 = sphi %s1559_s24, %s2052_s24  }
   0x4   : > { %s1584_s30 = sadd.s32 1, %s1499_s27   ;;  %s179_s8 = sadd.s32 1, %s1495_s26 }
   0x5   : > { %s176_s9 = ssub.s32 %s1499_s27, %s1584_s30  ;;  %p189_p0 = scmp.ne.s32.totalorder %s1495_s26, %s1491_s25 }
   0x6   : > { %p177_p1 = scmp.eq.s32.totalorder %s176_s9, 0  ;;  %p190_p2 = scmp.eq.s32.totalorder %s1580_s28, 1 }
   0x7   : > { %p195_p3 = scmp.ne.s32.totalorder %s1491_s25, %s1487_s24  ;;  %p196_p4 = scmp.eq.s32.totalorder %s1337_s29, 1 }
   0x8   : > { %s1595_s10 = scalar_select %p177_p1, %s1495_s26, %s179_s8  }
   0x9   : > { %p1597_p5 = por %p190_p2, %p189_p0  ;;  %p1601_p6 = por %p196_p4, %p195_p3 }
   0xa   : > { %p1340_p7 = scmp.ge.s32.totalorder %s1499_s27, 1  ;;  %p241_p8 = scmp.lt.s32.totalorder %s1499_s27, 3 }
   0xc   : > { %p242_p9 = pnand %p1340_p7, %p241_p8 }
   0xe   : > { %245 = sbr.rel (%p242_p9) target bundleno = 278 (0x116), region = 48 }
  0x13   : > { %v280_v0 = vld [vmem:[%s2020_s1] sm:$0xff]  ;;  %v1501_v1 = vmov 1   ;;  %v1502_v2 = vmov 0   ;;  %v281_v3 = vld [vmem:[%s2020_s1 + $0x8] sm:$0xff]  ;;  %v1503_v4 = vmov 3   ;;  %v1504_v7 = vmov 2  }
  0x14   : > { %1407 = vset.pattern.permute.xlu0 %v1501_v1  ;;  %1406 = vset.pattern.permute.xlu1 %v1502_v2  ;;  %v282_v5 = vld [vmem:[%s2021_s2] sm:$0xff]  ;;  %v283_v6 = vld [vmem:[%s2021_s2 + $0x8] sm:$0xff]  ;;  %v1505_v10 = vmov 5   ;;  %v1506_v11 = vmov 8   ;;  %v1507_v12 = vmov 11   ;;  %v1508_v13 = vmov 14  }
  0x15   : > { %365 = vperm.xlu0 %1407, %v280_v0   ;;  %302 = vperm.xlu1 %1406, %v280_v0   ;;  %v284_v8 = vld [vmem:[%s2022_s3] sm:$0xff]  ;;  %v1509_v14 = vmov 4   ;;  %v1510_v16 = vmov 6   ;;  %v1511_v18 = vmov 7   ;;  %v1512_v19 = vmov 9   ;;  %s1342_s15 = sshll.u32 %s1580_s28, 2 }
  0x16   : > { %v285_v9 = vld [vmem:[%s2023_s4] sm:$0xff]  ;;  %v1513_v20 = vmov 10   ;;  %v1514_v21 = vmov 12   ;;  %v1515_v22 = vmov 13   ;;  %v1516_v23 = vmov 15   ;;  %p274_p10 = scmp.lt.s32.totalorder %s1342_s15, 7 }
  0x17   : > { %v287_v15 = vld [vmem:[%s2025_s6] sm:$0x3]  ;;  %v312_v24 = vlaneseq  ;;  %s270_s20 = sand.u32 1, %s1491_s25   ;;  %s1349_s22 = sshll.u32 %s1580_s28, 7 }
  0x18   : > { %v286_v17 = vld [vmem:[%s2024_s5] sm:$0x3]  ;;  %s2057_s15 = smov (!%p274_p10, %s1342_s15), 7  ;;  %s1341_s21 = sshll.u32 %s270_s20, 3 }
  0x19   : > { %1410 = vset.pattern.permute.xlu0 %v1503_v4  ;;  %307 = vperm.xlu1 %1406, %v281_v3   ;;  %s1343_s16 = sshll.u32 %s2057_s15, 2  ;;  %v1644_v25 = vshrl.u32 %v312_v24, 7  ;;  %s272_s23 = scalar_lea.vmem [#allocation2], %s1341_s21 }
  0x1a   : > { %477 = vperm.xlu0 %1410, %v280_v0   ;;  %s277_s19 = scalar_lea.vmem %s2019_s0, %s1343_s16  ;;  %s1278_s29 = sshll.u32 %s272_s23, 4  ;;  %s1279_s29 = int_to_ptr.vmem [resolvable:$true] %s1278_s29 }
  0x1b   : > { %2036 = vst [vmem:[#allocation5_spill] sm:$0xff] %v1644_v25  ;;  %v1650_v28 = vsub.s32 0, %v1644_v25  ;;  %v1653_v29 = vsub.s32 4, %v1644_v25  ;;  %v288_v30 = vld [vmem:[%s277_s19] sm:$0xff]  ;;  %v289_v31 = vld [vmem:[%s277_s19 + $0x8] sm:$0xff]  ;;  %v1656_v32 = vsub.s32 1, %v1644_v25  ;;  %s1276_s13 = scalar_lea.hbm %s2026_s7, %s1349_s22 }
  0x1c   : > { %v1659_v33 = vsub.s32 5, %v1644_v25  ;;  %v1662_v34 = vsub.s32 3, %v1644_v25  ;;  %v1665_v35 = vsub.s32 7, %v1644_v25  ;;  %v1670_v37 = vsub.s32 2, %v1644_v25  ;;  %s1264_s14 = scalar_lea.sflag [#allocation3], %s270_s20  ;;  %s1439_s15 = scalar_lea.vmem %s1279_s29, 128 }
  0x1d   : > { %1408 = vset.pattern.permute.xlu1 %v1501_v1  ;;  %2037 = vst [vmem:[#allocation6_spill] sm:$0xff] %v1650_v28  ;;  %v1673_v38 = vsub.s32 6, %v1644_v25  ;;  %v315_v39 = vrot.slane %v288_v30, %v1650_v28  ;;  %v319_v40 = vrot.slane %v288_v30, %v1653_v29  ;;  %v323_v41 = vrot.slane %v289_v31, %v1650_v28  ;;  %p1440_p11 = scmp.ne.s32.totalorder %s1279_s29, %s1439_s15  ;;  %s1518_s16 = smov [#allocation2]  }
  0x1e   : > { %1411 = vset.pattern.permute.xlu0 %v1502_v2  ;;  %369 = vperm.xlu1 %1408, %v281_v3   ;;  %2038 = vst [vmem:[#allocation7_spill] sm:$0xff] %v1662_v34  ;;  %v327_v42 = vrot.slane %v289_v31, %v1653_v29  ;;  %v375_v43 = vrot.slane %v288_v30, %v1656_v32  ;;  %s1443_s28 = sshll.u32 %s1518_s16, 4  ;;  %s1444_s28 = int_to_ptr.vmem [resolvable:$false] %s1443_s28 }
  0x1f   : > { %292 = vperm.xlu0 %1411, %v282_v5   ;;  %2039 = vst [vmem:[#allocation8_spill] sm:$0xff] %v1673_v38  ;;  %v379_v44 = vrot.slane %v288_v30, %v1659_v33  ;;  %v383_v45 = vrot.slane %v289_v31, %v1656_v32  ;;  %v387_v46 = vrot.slane %v289_v31, %v1659_v33  ;;  %p1441_p12 = pnand %p1440_p11, %p1597_p5  ;;  %s1445_s17 = scalar_lea.vmem %s1444_s28, 256 }
  0x20   : > { %v487_v48 = vrot.slane %v288_v30, %v1662_v34  ;;  %v491_v49 = vrot.slane %v288_v30, %v1665_v35  ;;  %v495_v50 = vrot.slane %v289_v31, %v1662_v34  ;;  %v499_v51 = vrot.slane %v289_v31, %v1665_v35  ;;  %p1446_p0 = scmp.lt.s32.totalorder %s1279_s29, %s1444_s28  ;;  %p1447_p1 = scmp.lt.s32.totalorder %s1445_s17, %s1439_s15 }
  0x21   : > { %v427_v52 = vrot.slane %v288_v30, %v1670_v37  ;;  %v431_v53 = vrot.slane %v288_v30, %v1673_v38  ;;  %v435_v54 = vrot.slane %v289_v31, %v1670_v37  ;;  %v439_v55 = vrot.slane %v289_v31, %v1673_v38  ;;  %p1442_p13 = pneg %p1441_p12 }
  0x22   : > { %1409 = vset.pattern.permute.xlu1 %v1504_v7  ;;  %v335_v56 = vrot.slane %v315_v39, %v1650_v28  ;;  %v339_v57 = vrot.slane %v319_v40, %v1650_v28  ;;  %v343_v58 = vrot.slane %v323_v41, %v1650_v28  ;;  %v347_v59 = vrot.slane %v327_v42, %v1650_v28  ;;  %p1448_p2 = por %p1447_p1, %p1446_p0 }
  0x23   : > { %297 = vperm.xlu0 %1411, %v283_v6   ;;  %417 = vperm.xlu1 %1409, %v280_v0   ;;  %v395_v61 = vrot.slane %v375_v43, %v1656_v32  ;;  %v399_v62 = vrot.slane %v379_v44, %v1656_v32  ;;  %v403_v63 = vrot.slane %v383_v45, %v1656_v32 }
  0x24   : > { %v407_v0 = vrot.slane %v387_v46, %v1656_v32  ;;  %v447_v6 = vrot.slane %v427_v52, %v1670_v37  ;;  %p1449_p3 = pnand %p1448_p2, %p1442_p13 }
  0x27   : > { %559 = vperm.xlu0 %1411, %v284_v8   ;;  %421 = vperm.xlu1 %1409, %v281_v3  }
  0x2b   : > { %1415 = vset.pattern.permute.xlu0 %v1504_v7  ;;  %1412 = vset.pattern.permute.xlu1 %v1503_v4 }
  0x2c   : > { %611 = vperm.xlu0 %1415, %v284_v8   ;;  %481 = vperm.xlu1 %1412, %v281_v3   ;;  %v515_v3 = vrot.slane %v495_v50, %v1662_v34 }
  0x30   : > { %1418 = vset.pattern.permute.xlu0 %v1505_v10  ;;  %1413 = vset.pattern.permute.xlu1 %v1502_v2 }
  0x31   : > { %695 = vperm.xlu0 %1418, %v284_v8   ;;  %554 = vperm.xlu1 %1413, %v285_v9   ;;  %v459_v9 = vrot.slane %v439_v55, %v1670_v37 }
  0x35   : > { %1421 = vset.pattern.permute.xlu0 %v1506_v11  ;;  %1414 = vset.pattern.permute.xlu1 %v1501_v1 }
  0x36   : > { %779 = vperm.xlu0 %1421, %v284_v8   ;;  %587 = vperm.xlu1 %1414, %v284_v8  }
  0x3a   : > { %1424 = vset.pattern.permute.xlu0 %v1507_v12  ;;  %1416 = vset.pattern.permute.xlu1 %v1503_v4 }
  0x3b   : > { %863 = vperm.xlu0 %1424, %v284_v8   ;;  %639 = vperm.xlu1 %1416, %v284_v8  }
  0x3f   : > { %1427 = vset.pattern.permute.xlu0 %v1508_v13  ;;  %1417 = vset.pattern.permute.xlu1 %v1509_v14 }
  0x40   : > { %947 = vperm.xlu0 %1427, %v284_v8   ;;  %667 = vperm.xlu1 %1417, %v284_v8  }
  0x44   : > { %1419 = vset.pattern.permute.xlu1 %v1510_v16  ;;  %1430 = vset.pattern.permute.xlu0 %v1502_v2 }
  0x45   : > { %723 = vperm.xlu1 %1419, %v284_v8   ;;  %1012 = vperm.xlu0 %1430, %v287_v15  }
  0x49   : > { %1420 = vset.pattern.permute.xlu1 %v1511_v18  ;;  %1433 = vset.pattern.permute.xlu0 %v1503_v4  ;;  %v519_v4 = vrot.slane %v499_v51, %v1662_v34 }
  0x4a   : > { %751 = vperm.xlu1 %1420, %v284_v8   ;;  %1097 = vperm.xlu0 %1433, %v286_v17  }
  0x4e   : > { %1422 = vset.pattern.permute.xlu1 %v1512_v19  ;;  %1436 = vset.pattern.permute.xlu0 %v1510_v16 }
  0x4f   : > { %807 = vperm.xlu1 %1422, %v284_v8   ;;  %1181 = vperm.xlu0 %1436, %v286_v17  }
  0x53   : > { %1423 = vset.pattern.permute.xlu1 %v1513_v20  ;;  %1438 = vset.pattern.permute.xlu0 %v1511_v18 }
  0x54   : > { %835 = vperm.xlu1 %1423, %v284_v8  }
  0x58   : > { %1425 = vset.pattern.permute.xlu1 %v1514_v21 }
  0x59   : > { %891 = vperm.xlu1 %1425, %v284_v8  }
  0x5d   : > { %1426 = vset.pattern.permute.xlu1 %v1515_v22 }
  0x5e   : > { %919 = vperm.xlu1 %1426, %v284_v8  }
  0x62   : > { %1428 = vset.pattern.permute.xlu1 %v1516_v23 }
  0x63   : > { %975 = vperm.xlu1 %1428, %v284_v8   ;;  %v455_v8 = vrot.slane %v435_v54, %v1670_v37 }
  0x67   : > { %1429 = vset.pattern.permute.xlu1 %v1502_v2  ;;  %v511_v2 = vrot.slane %v491_v49, %v1662_v34 }
  0x68   : > { %1017 = vperm.xlu1 %1429, %v286_v17  }
  0x6c   : > { %1431 = vset.pattern.permute.xlu1 %v1501_v1  ;;  %v507_v1 = vrot.slane %v487_v48, %v1662_v34 }
  0x6d   : > { %1045 = vperm.xlu1 %1431, %v286_v17  }
  0x71   : > { %1432 = vset.pattern.permute.xlu1 %v1504_v7  ;;  %v451_v7 = vrot.slane %v431_v53, %v1670_v37 }
  0x72   : > { %1069 = vperm.xlu1 %1432, %v286_v17  }
  0x76   : > { %1434 = vset.pattern.permute.xlu1 %v1509_v14 }
  0x77   : > { %1125 = vperm.xlu1 %1434, %v286_v17  }
  0x7b   : > { %1435 = vset.pattern.permute.xlu1 %v1505_v10 }
  0x7c   : > { %1153 = vperm.xlu1 %1435, %v286_v17  }
  0x80   : > { %1437 = vset.pattern.permute.xlu1 %v1511_v18 }
  0x81   : > { %1209 = vperm.xlu1 %1437, %v286_v17  }
  0x90   : > { %v303_v26 = vpop.permute.xlu1 %302  ;;  %v366_v27 = vpop.permute.xlu0 %365 }
  0x91   : > { %v348_v10 = vmul.f32 %v335_v56, %v303_v26  ;;  %v349_v11 = vmul.f32 %v339_v57, %v303_v26  ;;  %v350_v12 = vmul.f32 %v343_v58, %v303_v26  ;;  %v351_v13 = vmul.f32 %v347_v59, %v303_v26 }
  0x92   : > { %v408_v14 = vmul.f32 %v395_v61, %v366_v27  ;;  %v409_v15 = vmul.f32 %v399_v62, %v366_v27  ;;  %v410_v16 = vmul.f32 %v403_v63, %v366_v27  ;;  %v411_v17 = vmul.f32 %v407_v0, %v366_v27 }
  0x94   : > { %v1667_v36 = vpop.permute.xlu1 %307 }
  0x95   : > { %v478_v47 = vpop.permute.xlu0 %477  ;;  %v353_v52 = vmul.f32 %v339_v57, %v1667_v36  ;;  %v354_v53 = vmul.f32 %v343_v58, %v1667_v36  ;;  %v355_v54 = vmul.f32 %v347_v59, %v1667_v36 }
  0x96   : > { %v520_v19 = vmul.f32 %v507_v1, %v478_v47  ;;  %v521_v20 = vmul.f32 %v511_v2, %v478_v47  ;;  %v522_v21 = vmul.f32 %v515_v3, %v478_v47  ;;  %v523_v22 = vmul.f32 %v519_v4, %v478_v47 }
  0x97   : > { %v352_v47 = vmul.f32 %v335_v56, %v1667_v36 }
  0x98   : > { %v528_v26 = vadd.f32 %v520_v19, %v408_v14  ;;  %v529_v45 = vadd.f32 %v521_v20, %v409_v15  ;;  %v530_v46 = vadd.f32 %v522_v21, %v410_v16  ;;  %v531_v48 = vadd.f32 %v523_v22, %v411_v17 }
  0x99   : > { %v370_v60 = vpop.permute.xlu1 %369 }
  0x9a   : > { %v293_v5 = vpop.permute.xlu0 %292 }
  0x9b   : > { %v356_v39 = vadd.f32 %v348_v10, %v293_v5  ;;  %v357_v40 = vadd.f32 %v349_v11, %v293_v5  ;;  %v358_v41 = vadd.f32 %v350_v12, %v293_v5  ;;  %v359_v42 = vadd.f32 %v351_v13, %v293_v5 }
  0x9c   : > { %v412_v5 = vmul.f32 %v395_v61, %v370_v60  ;;  %v413_v10 = vmul.f32 %v399_v62, %v370_v60  ;;  %v414_v11 = vmul.f32 %v403_v63, %v370_v60  ;;  %v415_v12 = vmul.f32 %v407_v0, %v370_v60 }
  0x9e   : > { %v418_v18 = vpop.permute.xlu1 %417  ;;  %v298_v43 = vpop.permute.xlu0 %297 }
  0x9f   : > { %v460_v23 = vmul.f32 %v447_v6, %v418_v18  ;;  %v461_v24 = vmul.f32 %v451_v7, %v418_v18  ;;  %v462_v30 = vmul.f32 %v455_v8, %v418_v18  ;;  %v463_v31 = vmul.f32 %v459_v9, %v418_v18 }
  0xa0   : > { %v360_v21 = vadd.f32 %v352_v47, %v298_v43  ;;  %v361_v57 = vadd.f32 %v353_v52, %v298_v43  ;;  %v362_v22 = vadd.f32 %v354_v53, %v298_v43  ;;  %v363_v58 = vadd.f32 %v355_v54, %v298_v43 }
  0xa1   : > { %v468_v27 = vadd.f32 %v460_v23, %v356_v39  ;;  %v469_v49 = vadd.f32 %v461_v24, %v357_v40  ;;  %v470_v50 = vadd.f32 %v462_v30, %v358_v41  ;;  %v471_v51 = vadd.f32 %v463_v31, %v359_v42 }
  0xa2   : > { %v422_v44 = vpop.permute.xlu1 %421  ;;  %v560_v55 = vpop.permute.xlu0 %559 }
  0xa3   : > { %v536_v14 = vadd.f32 %v528_v26, %v468_v27  ;;  %v537_v15 = vadd.f32 %v529_v45, %v469_v49  ;;  %v538_v16 = vadd.f32 %v530_v46, %v470_v50  ;;  %v539_v17 = vadd.f32 %v531_v48, %v471_v51 }
  0xa4   : > { %v464_v23 = vmul.f32 %v447_v6, %v422_v44  ;;  %v465_v36 = vmul.f32 %v451_v7, %v422_v44  ;;  %v466_v59 = vmul.f32 %v455_v8, %v422_v44  ;;  %v467_v61 = vmul.f32 %v459_v9, %v422_v44 }
  0xa5   : > { %v1711_v62 = vmax.f32 %v536_v14, 0.0  ;;  %v1713_v60 = vmax.f32 %v537_v15, 0.0  ;;  %v1715_v63 = vmax.f32 %v538_v16, 0.0  ;;  %v1717_v0 = vmax.f32 %v539_v17, 0.0 }
  0xa6   : > { %v472_v31 = vadd.f32 %v464_v23, %v360_v21  ;;  %v473_v39 = vadd.f32 %v465_v36, %v361_v57  ;;  %v474_v6 = vadd.f32 %v466_v59, %v362_v22  ;;  %v475_v7 = vadd.f32 %v467_v61, %v363_v58 }
  0xa7   : > { %v482_v13 = vpop.permute.xlu1 %481  ;;  %v565_v8 = vrot.slane %v1711_v62, %v1650_v28  ;;  %v569_v9 = vrot.slane %v1713_v60, %v1650_v28  ;;  %v573_v40 = vrot.slane %v1715_v63, %v1650_v28  ;;  %v577_v41 = vrot.slane %v1717_v0, %v1650_v28 }
  0xa8   : > { %v524_v18 = vmul.f32 %v507_v1, %v482_v13  ;;  %v525_v19 = vmul.f32 %v511_v2, %v482_v13  ;;  %v526_v20 = vmul.f32 %v515_v3, %v482_v13  ;;  %v527_v56 = vmul.f32 %v519_v4, %v482_v13  ;;  %v612_v1 = vpop.permute.xlu0 %611 }
  0xa9   : > { %v617_v46 = vrot.slane %v1711_v62, %v1670_v37  ;;  %v621_v48 = vrot.slane %v1713_v60, %v1670_v37  ;;  %v625_v27 = vrot.slane %v1715_v63, %v1670_v37  ;;  %v629_v49 = vrot.slane %v1717_v0, %v1670_v37 }
  0xaa   : > { %v532_v3 = vadd.f32 %v524_v18, %v412_v5  ;;  %v533_v4 = vadd.f32 %v525_v19, %v413_v10  ;;  %v534_v24 = vadd.f32 %v526_v20, %v414_v11  ;;  %v535_v30 = vadd.f32 %v527_v56, %v415_v12 }
  0xab   : > { %v578_v51 = vmul.f32 %v565_v8, %v560_v55  ;;  %v579_v47 = vmul.f32 %v569_v9, %v560_v55  ;;  %v580_v52 = vmul.f32 %v573_v40, %v560_v55  ;;  %v581_v53 = vmul.f32 %v577_v41, %v560_v55 }
  0xac   : > { %v555_v2 = vpop.permute.xlu1 %554  ;;  %v540_v42 = vadd.f32 %v532_v3, %v472_v31  ;;  %v541_v43 = vadd.f32 %v533_v4, %v473_v39  ;;  %v542_v44 = vadd.f32 %v534_v24, %v474_v6  ;;  %v543_v26 = vadd.f32 %v535_v30, %v475_v7  ;;  %v696_v50 = vpop.permute.xlu0 %695 }
  0xad   : > { %v630_v12 = vmul.f32 %v617_v46, %v612_v1  ;;  %v631_v13 = vmul.f32 %v621_v48, %v612_v1  ;;  %v632_v14 = vmul.f32 %v625_v27, %v612_v1  ;;  %v633_v15 = vmul.f32 %v629_v49, %v612_v1 }
  0xae   : > { %v1735_v54 = vmax.f32 %v540_v42, 0.0  ;;  %v1737_v5 = vmax.f32 %v541_v43, 0.0  ;;  %v1739_v10 = vmax.f32 %v542_v44, 0.0  ;;  %v1741_v11 = vmax.f32 %v543_v26, 0.0 }
  0xaf   : > { %v582_v17 = vadd.f32 %v578_v51, %v555_v2  ;;  %v583_v18 = vadd.f32 %v579_v47, %v555_v2  ;;  %v584_v19 = vadd.f32 %v580_v52, %v555_v2  ;;  %v585_v20 = vadd.f32 %v581_v53, %v555_v2 }
  0xb0   : > { %v701_v55 = vrot.slane %v1711_v62, %v1659_v33  ;;  %v705_v56 = vrot.slane %v1713_v60, %v1659_v33  ;;  %v709_v21 = vrot.slane %v1715_v63, %v1659_v33  ;;  %v713_v57 = vrot.slane %v1717_v0, %v1659_v33 }
  0xb1   : > { %v588_v45 = vpop.permute.xlu1 %587  ;;  %v780_v22 = vpop.permute.xlu0 %779  ;;  %v785_v58 = vrot.slane %v1735_v54, %v1650_v28  ;;  %v789_v23 = vrot.slane %v1737_v5, %v1650_v28  ;;  %v793_v36 = vrot.slane %v1739_v10, %v1650_v28  ;;  %v797_v59 = vrot.slane %v1741_v11, %v1650_v28 }
  0xb2   : > { %v1759_v61 = vmul.f32 %v701_v55, %v696_v50  ;;  %v1761_v1 = vmul.f32 %v705_v56, %v696_v50  ;;  %v1763_v2 = vmul.f32 %v709_v21, %v696_v50  ;;  %v1765_v3 = vmul.f32 %v713_v57, %v696_v50 }
  0xb3   : > { %v634_v4 = vadd.f32 %v630_v12, %v582_v17  ;;  %v635_v24 = vadd.f32 %v631_v13, %v583_v18  ;;  %v636_v30 = vadd.f32 %v632_v14, %v584_v19  ;;  %v637_v31 = vadd.f32 %v633_v15, %v585_v20 }
  0xb4   : > { %v593_v6 = vrot.slane %v1711_v62, %v1656_v32  ;;  %v597_v7 = vrot.slane %v1713_v60, %v1656_v32  ;;  %v601_v8 = vrot.slane %v1715_v63, %v1656_v32  ;;  %v605_v9 = vrot.slane %v1717_v0, %v1656_v32 }
  0xb5   : > { %v1775_v40 = vmul.f32 %v785_v58, %v780_v22  ;;  %v1777_v41 = vmul.f32 %v789_v23, %v780_v22  ;;  %v1779_v42 = vmul.f32 %v793_v36, %v780_v22  ;;  %v1781_v43 = vmul.f32 %v797_v59, %v780_v22 }
  0xb6   : > { %v640_v16 = vpop.permute.xlu1 %639  ;;  %v606_v44 = vmul.f32 %v593_v6, %v588_v45  ;;  %v607_v26 = vmul.f32 %v597_v7, %v588_v45  ;;  %v608_v46 = vmul.f32 %v601_v8, %v588_v45  ;;  %v609_v48 = vmul.f32 %v605_v9, %v588_v45  ;;  %v864_v27 = vpop.permute.xlu0 %863 }
  0xb7   : > { %v869_v49 = vrot.slane %v1735_v54, %v1662_v34  ;;  %v873_v50 = vrot.slane %v1737_v5, %v1662_v34  ;;  %v877_v51 = vrot.slane %v1739_v10, %v1662_v34  ;;  %v881_v47 = vrot.slane %v1741_v11, %v1662_v34 }
  0xb8   : > { %v645_v52 = vrot.slane %v1711_v62, %v1662_v34  ;;  %v649_v53 = vrot.slane %v1713_v60, %v1662_v34  ;;  %v653_v45 = vrot.slane %v1715_v63, %v1662_v34  ;;  %v657_v12 = vrot.slane %v1717_v0, %v1662_v34 }
  0xb9   : > { %v1799_v14 = vmul.f32 %v869_v49, %v864_v27  ;;  %v1801_v15 = vmul.f32 %v873_v50, %v864_v27  ;;  %v1803_v17 = vmul.f32 %v877_v51, %v864_v27  ;;  %v1805_v18 = vmul.f32 %v881_v47, %v864_v27 }
  0xba   : > { %v658_v19 = vmul.f32 %v645_v52, %v640_v16  ;;  %v659_v20 = vmul.f32 %v649_v53, %v640_v16  ;;  %v660_v55 = vmul.f32 %v653_v45, %v640_v16  ;;  %v661_v56 = vmul.f32 %v657_v12, %v640_v16 }
  0xbb   : > { %v668_v39 = vpop.permute.xlu1 %667  ;;  %2040 = vst [vmem:[#allocation9_spill] sm:$0xff] %v1799_v14  ;;  %2041 = vst [vmem:[#allocation10_spill] sm:$0xff] %v1801_v15  ;;  %v673_v21 = vrot.slane %v1711_v62, %v1653_v29  ;;  %v677_v57 = vrot.slane %v1713_v60, %v1653_v29  ;;  %v681_v22 = vrot.slane %v1715_v63, %v1653_v29  ;;  %v948_v52 = vpop.permute.xlu0 %947 }
  0xbc   : > { %2042 = vst [vmem:[#allocation11_spill] sm:$0xff] %v1803_v17  ;;  %2043 = vst [vmem:[#allocation12_spill] sm:$0xff] %v1805_v18  ;;  %v685_v58 = vrot.slane %v1717_v0, %v1653_v29  ;;  %v729_v23 = vrot.slane %v1711_v62, %v1673_v38  ;;  %v733_v36 = vrot.slane %v1713_v60, %v1673_v38 }
  0xbd   : > { %v737_v16 = vrot.slane %v1715_v63, %v1673_v38  ;;  %v741_v59 = vrot.slane %v1717_v0, %v1673_v38  ;;  %v686_v6 = vmul.f32 %v673_v21, %v668_v39  ;;  %v687_v7 = vmul.f32 %v677_v57, %v668_v39 }
  0xbe   : > { %v688_v8 = vmul.f32 %v681_v22, %v668_v39  ;;  %v689_v9 = vmul.f32 %v685_v58, %v668_v39  ;;  %v953_v49 = vrot.slane %v1735_v54, %v1673_v38  ;;  %v957_v50 = vrot.slane %v1737_v5, %v1673_v38 }
  0xbf   : > { %v961_v51 = vrot.slane %v1739_v10, %v1673_v38  ;;  %v965_v47 = vrot.slane %v1741_v11, %v1673_v38  ;;  %v662_v57 = vadd.f32 %v658_v19, %v606_v44  ;;  %v663_v39 = vadd.f32 %v659_v20, %v607_v26 }
  0xc0   : > { %v724_v13 = vpop.permute.xlu1 %723  ;;  %v664_v22 = vadd.f32 %v660_v55, %v608_v46  ;;  %v665_v58 = vadd.f32 %v661_v56, %v609_v48  ;;  %v690_v25 = vadd.f32 %v686_v6, %v634_v4  ;;  %v691_v34 = vadd.f32 %v687_v7, %v635_v24 }
  0xc1   : > { %v742_v53 = vmul.f32 %v729_v23, %v724_v13  ;;  %v743_v45 = vmul.f32 %v733_v36, %v724_v13  ;;  %v744_v12 = vmul.f32 %v737_v16, %v724_v13  ;;  %v745_v21 = vmul.f32 %v741_v59, %v724_v13 }
  0xc2   : > { %v692_v28 = vadd.f32 %v688_v8, %v636_v30  ;;  %v693_v18 = vadd.f32 %v689_v9, %v637_v31  ;;  %v1831_v17 = vmul.f32 %v953_v49, %v948_v52  ;;  %v1833_v15 = vmul.f32 %v957_v50, %v948_v52 }
  0xc3   : > { %v1835_v14 = vmul.f32 %v961_v51, %v948_v52  ;;  %v1837_v38 = vmul.f32 %v965_v47, %v948_v52  ;;  %v746_v36 = vadd.f32 %v742_v53, %v690_v25  ;;  %v747_v16 = vadd.f32 %v743_v45, %v691_v34 }
  0xc4   : > { %v748_v13 = vadd.f32 %v744_v12, %v692_v28  ;;  %v749_v44 = vadd.f32 %v745_v21, %v693_v18  ;;  %v757_v26 = vrot.slane %v1711_v62, %v1665_v35  ;;  %v761_v4 = vrot.slane %v1713_v60, %v1665_v35 }
  0xc5   : > { %v752_v27 = vpop.permute.xlu1 %751  ;;  %v765_v24 = vrot.slane %v1715_v63, %v1665_v35  ;;  %v769_v30 = vrot.slane %v1717_v0, %v1665_v35  ;;  %v813_v31 = vrot.slane %v1735_v54, %v1656_v32  ;;  %v817_v25 = vrot.slane %v1737_v5, %v1656_v32 }
  0xc6   : > { %v821_v28 = vrot.slane %v1739_v10, %v1656_v32  ;;  %v825_v34 = vrot.slane %v1741_v11, %v1656_v32  ;;  %v770_v62 = vmul.f32 %v757_v26, %v752_v27  ;;  %v771_v60 = vmul.f32 %v761_v4, %v752_v27 }
  0xc7   : > { %v772_v46 = vmul.f32 %v765_v24, %v752_v27  ;;  %v773_v48 = vmul.f32 %v769_v30, %v752_v27  ;;  %v718_v63 = vadd.f32 %v1759_v61, %v662_v57  ;;  %v719_v0 = vadd.f32 %v1761_v1, %v663_v39 }
  0xc8   : > { %v720_v18 = vadd.f32 %v1763_v2, %v664_v22  ;;  %v721_v19 = vadd.f32 %v1765_v3, %v665_v58  ;;  %v802_v7 = vadd.f32 %v1775_v40, %v746_v36  ;;  %v803_v8 = vadd.f32 %v1777_v41, %v747_v16 }
  0xc9   : > { %v804_v9 = vadd.f32 %v1779_v42, %v748_v13  ;;  %v805_v27 = vadd.f32 %v1781_v43, %v749_v44  ;;  %v774_v61 = vadd.f32 %v770_v62, %v718_v63  ;;  %v775_v49 = vadd.f32 %v771_v60, %v719_v0  ;;  %v2044_v63 = vld [vmem:[#allocation9_spill] sm:$0xff] }
  0xca   : > { %v808_v23 = vpop.permute.xlu1 %807  ;;  %v776_v1 = vadd.f32 %v772_v46, %v720_v18  ;;  %v777_v50 = vadd.f32 %v773_v48, %v721_v19  ;;  %v841_v2 = vrot.slane %v1735_v54, %v1670_v37  ;;  %v845_v3 = vrot.slane %v1737_v5, %v1670_v37  ;;  %v2045_v18 = vld [vmem:[#allocation10_spill] sm:$0xff] }
  0xcb   : > { %v826_v55 = vmul.f32 %v813_v31, %v808_v23  ;;  %v827_v56 = vmul.f32 %v817_v25, %v808_v23  ;;  %v828_v59 = vmul.f32 %v821_v28, %v808_v23  ;;  %v829_v6 = vmul.f32 %v825_v34, %v808_v23 }
  0xcc   : > { %v849_v51 = vrot.slane %v1739_v10, %v1670_v37  ;;  %v853_v40 = vrot.slane %v1741_v11, %v1670_v37  ;;  %v897_v57 = vrot.slane %v1735_v54, %v1653_v29  ;;  %v901_v39 = vrot.slane %v1737_v5, %v1653_v29 }
  0xcd   : > { %v830_v41 = vadd.f32 %v826_v55, %v774_v61  ;;  %v831_v42 = vadd.f32 %v827_v56, %v775_v49  ;;  %v832_v47 = vadd.f32 %v828_v59, %v776_v1  ;;  %v833_v43 = vadd.f32 %v829_v6, %v777_v50  ;;  %v2047_v56 = vld [vmem:[#allocation12_spill] sm:$0xff] }
  0xce   : > { %v905_v22 = vrot.slane %v1739_v10, %v1653_v29  ;;  %v909_v58 = vrot.slane %v1741_v11, %v1653_v29  ;;  %v925_v23 = vrot.slane %v1735_v54, %v1659_v33  ;;  %v929_v36 = vrot.slane %v1737_v5, %v1659_v33 }
  0xcf   : > { %v836_v20 = vpop.permute.xlu1 %835  ;;  %v933_v16 = vrot.slane %v1739_v10, %v1659_v33  ;;  %v937_v13 = vrot.slane %v1741_v11, %v1659_v33  ;;  %v886_v0 = vadd.f32 %v2044_v63, %v830_v41  ;;  %v887_v19 = vadd.f32 %v2045_v18, %v831_v42 }
  0xd0   : > { %v854_v53 = vmul.f32 %v841_v2, %v836_v20  ;;  %v855_v45 = vmul.f32 %v845_v3, %v836_v20  ;;  %v856_v12 = vmul.f32 %v849_v51, %v836_v20  ;;  %v857_v21 = vmul.f32 %v853_v40, %v836_v20  ;;  %v2046_v20 = vld [vmem:[#allocation11_spill] sm:$0xff] }
  0xd1   : > { %v888_v55 = vadd.f32 %v2046_v20, %v832_v47  ;;  %v889_v59 = vadd.f32 %v2047_v56, %v833_v43  ;;  %v993_v1 = vrot.slane %v1741_v11, %v1665_v35 }
  0xd2   : > { %v858_v30 = vadd.f32 %v854_v53, %v802_v7  ;;  %v859_v31 = vadd.f32 %v855_v45, %v803_v8  ;;  %v860_v25 = vadd.f32 %v856_v12, %v804_v9  ;;  %v861_v28 = vadd.f32 %v857_v21, %v805_v27  ;;  %v1013_v21 = vpop.permute.xlu0 %1012 }
  0xd3   : > { %v981_v8 = vrot.slane %v1735_v54, %v1665_v35  ;;  %v985_v9 = vrot.slane %v1737_v5, %v1665_v35  ;;  %v989_v27 = vrot.slane %v1739_v10, %v1665_v35 }
  0xd4   : > { %v892_v52 = vpop.permute.xlu1 %891 }
  0xd5   : > { %v910_v44 = vmul.f32 %v897_v57, %v892_v52  ;;  %v911_v26 = vmul.f32 %v901_v39, %v892_v52  ;;  %v912_v4 = vmul.f32 %v905_v22, %v892_v52  ;;  %v913_v24 = vmul.f32 %v909_v58, %v892_v52 }
  0xd7   : > { %v914_v6 = vadd.f32 %v910_v44, %v858_v30  ;;  %v915_v61 = vadd.f32 %v911_v26, %v859_v31  ;;  %v916_v49 = vadd.f32 %v912_v4, %v860_v25  ;;  %v917_v7 = vadd.f32 %v913_v24, %v861_v28  ;;  %v1098_v30 = vpop.permute.xlu0 %1097  ;;  %v2049_v31 = vld [vmem:[#allocation7_spill] sm:$0xff] }
  0xd9   : > { %v920_v34 = vpop.permute.xlu1 %919  ;;  %v970_v54 = vadd.f32 %v1831_v17, %v914_v6  ;;  %v971_v52 = vadd.f32 %v1833_v15, %v915_v61  ;;  %v972_v5 = vadd.f32 %v1835_v14, %v916_v49  ;;  %v973_v10 = vadd.f32 %v1837_v38, %v917_v7 }
  0xda   : > { %v938_v62 = vmul.f32 %v925_v23, %v920_v34  ;;  %v939_v60 = vmul.f32 %v929_v36, %v920_v34  ;;  %v940_v46 = vmul.f32 %v933_v16, %v920_v34  ;;  %v941_v48 = vmul.f32 %v937_v13, %v920_v34  ;;  %v2048_v13 = vld [vmem:[#allocation6_spill] sm:$0xff] }
  0xdb   : > { %v1517_v14 = vmov 1983009808  }
  0xdc   : > { %v942_v50 = vadd.f32 %v938_v62, %v886_v0  ;;  %v943_v2 = vadd.f32 %v939_v60, %v887_v19  ;;  %v944_v3 = vadd.f32 %v940_v46, %v888_v55  ;;  %v945_v51 = vadd.f32 %v941_v48, %v889_v59  ;;  %v2050_v59 = vld [vmem:[#allocation8_spill] sm:$0xff] }
  0xdd   : > { %v1911_v38 = vunpack.c.l.s4 %v1517_v14 }
  0xde   : > { %v976_v40 = vpop.permute.xlu1 %975 }
  0xdf   : > { %v994_v41 = vmul.f32 %v981_v8, %v976_v40  ;;  %v995_v42 = vmul.f32 %v985_v9, %v976_v40  ;;  %v996_v47 = vmul.f32 %v989_v27, %v976_v40  ;;  %v997_v43 = vmul.f32 %v993_v1, %v976_v40 }
  0xe0   : > { %v1248_v18 = vunpack.c.0.s8 %v1911_v38 }
  0xe1   : > { %v998_v53 = vadd.f32 %v994_v41, %v942_v50  ;;  %v999_v45 = vadd.f32 %v995_v42, %v943_v2  ;;  %v1000_v11 = vadd.f32 %v996_v47, %v944_v3  ;;  %v1001_v12 = vadd.f32 %v997_v43, %v945_v51  ;;  %v1182_v2 = vpop.permute.xlu0 %1181 }
  0xe3   : > { %v1002_v57 = vadd.f32 %v998_v53, %v970_v54  ;;  %v1003_v39 = vadd.f32 %v999_v45, %v971_v52  ;;  %v1004_v22 = vadd.f32 %v1000_v11, %v972_v5  ;;  %v1005_v58 = vadd.f32 %v1001_v12, %v973_v10  ;;  %v1018_v23 = vpop.permute.xlu1 %1017 }
  0xe5   : > { %v1903_v36 = vmax.f32 %v1002_v57, 0.0  ;;  %v1905_v16 = vmax.f32 %v1003_v39, 0.0  ;;  %v1907_v17 = vmax.f32 %v1004_v22, 0.0  ;;  %v1909_v15 = vmax.f32 %v1005_v58, 0.0 }
  0xe7   : > { %v1023_v44 = vrot.slane %v1903_v36, %v2048_v13  ;;  %v1027_v26 = vrot.slane %v1905_v16, %v2048_v13  ;;  %v1031_v4 = vrot.slane %v1907_v17, %v2048_v13  ;;  %v1035_v24 = vrot.slane %v1909_v15, %v2048_v13 }
  0xe8   : > { %v1103_v25 = vrot.slane %v1903_v36, %v2049_v31  ;;  %v1107_v28 = vrot.slane %v1905_v16, %v2049_v31  ;;  %v1111_v34 = vrot.slane %v1907_v17, %v2049_v31  ;;  %v1115_v62 = vrot.slane %v1909_v15, %v2049_v31  ;;  %v1046_v60 = vpop.permute.xlu1 %1045 }
  0xe9   : > { %v1036_v46 = vmul.f32 %v1023_v44, %v1018_v23  ;;  %v1037_v48 = vmul.f32 %v1027_v26, %v1018_v23  ;;  %v1038_v63 = vmul.f32 %v1031_v4, %v1018_v23  ;;  %v1039_v0 = vmul.f32 %v1035_v24, %v1018_v23 }
  0xea   : > { %v1116_v19 = vmul.f32 %v1103_v25, %v1098_v30  ;;  %v1117_v20 = vmul.f32 %v1107_v28, %v1098_v30  ;;  %v1118_v55 = vmul.f32 %v1111_v34, %v1098_v30  ;;  %v1119_v56 = vmul.f32 %v1115_v62, %v1098_v30 }
  0xeb   : > { %v1187_v6 = vrot.slane %v1903_v36, %v2050_v59  ;;  %v1191_v61 = vrot.slane %v1905_v16, %v2050_v59  ;;  %v1195_v49 = vrot.slane %v1907_v17, %v2050_v59  ;;  %v1199_v7 = vrot.slane %v1909_v15, %v2050_v59 }
  0xec   : > { %v1040_v9 = vadd.f32 %v1036_v46, %v1013_v21  ;;  %v1041_v27 = vadd.f32 %v1037_v48, %v1013_v21  ;;  %v1042_v1 = vadd.f32 %v1038_v63, %v1013_v21  ;;  %v1043_v50 = vadd.f32 %v1039_v0, %v1013_v21 }
  0xed   : > { %v1070_v8 = vpop.permute.xlu1 %1069  ;;  %v1051_v3 = vrot.slane %v1903_v36, %v1656_v32  ;;  %v1055_v51 = vrot.slane %v1905_v16, %v1656_v32  ;;  %v1059_v40 = vrot.slane %v1907_v17, %v1656_v32  ;;  %v1063_v41 = vrot.slane %v1909_v15, %v1656_v32 }
  0xee   : > { %v1075_v42 = vrot.slane %v1903_v36, %v1670_v37  ;;  %v1079_v47 = vrot.slane %v1905_v16, %v1670_v37  ;;  %v1083_v43 = vrot.slane %v1907_v17, %v1670_v37  ;;  %v1087_v54 = vrot.slane %v1909_v15, %v1670_v37 }
  0xef   : > { %v1200_v52 = vmul.f32 %v1187_v6, %v1182_v2  ;;  %v1201_v5 = vmul.f32 %v1191_v61, %v1182_v2  ;;  %v1202_v10 = vmul.f32 %v1195_v49, %v1182_v2  ;;  %v1203_v53 = vmul.f32 %v1199_v7, %v1182_v2 }
  0xf0   : > { %v1088_v45 = vmul.f32 %v1075_v42, %v1070_v8  ;;  %v1089_v11 = vmul.f32 %v1079_v47, %v1070_v8  ;;  %v1090_v12 = vmul.f32 %v1083_v43, %v1070_v8  ;;  %v1091_v32 = vmul.f32 %v1087_v54, %v1070_v8 }
  0xf1   : > { %v1131_v57 = vrot.slane %v1903_v36, %v1653_v29  ;;  %v1135_v39 = vrot.slane %v1905_v16, %v1653_v29  ;;  %v1139_v22 = vrot.slane %v1907_v17, %v1653_v29  ;;  %v1143_v37 = vrot.slane %v1909_v15, %v1653_v29 }
  0xf2   : > { %v1126_v21 = vpop.permute.xlu1 %1125  ;;  %v1064_v58 = vmul.f32 %v1051_v3, %v1046_v60  ;;  %v1065_v23 = vmul.f32 %v1055_v51, %v1046_v60  ;;  %v1066_v14 = vmul.f32 %v1059_v40, %v1046_v60  ;;  %v1067_v13 = vmul.f32 %v1063_v41, %v1046_v60 }
  0xf3   : > { %v1144_v44 = vmul.f32 %v1131_v57, %v1126_v21  ;;  %v1145_v26 = vmul.f32 %v1135_v39, %v1126_v21  ;;  %v1146_v4 = vmul.f32 %v1139_v22, %v1126_v21  ;;  %v1147_v24 = vmul.f32 %v1143_v37, %v1126_v21 }
  0xf4   : > { %v1159_v30 = vrot.slane %v1903_v36, %v1659_v33  ;;  %v1163_v31 = vrot.slane %v1905_v16, %v1659_v33  ;;  %v1167_v25 = vrot.slane %v1907_v17, %v1659_v33  ;;  %v1171_v29 = vrot.slane %v1909_v15, %v1659_v33 }
  0xf5   : > { %v1092_v28 = vadd.f32 %v1088_v45, %v1040_v9  ;;  %v1093_v34 = vadd.f32 %v1089_v11, %v1041_v27  ;;  %v1094_v62 = vadd.f32 %v1090_v12, %v1042_v1  ;;  %v1095_v60 = vadd.f32 %v1091_v32, %v1043_v50  ;;  %v2051_v11 = vld [vmem:[#allocation5_spill] sm:$0xff] }
  0xf6   : > { %v1120_v6 = vadd.f32 %v1116_v19, %v1064_v58  ;;  %v1121_v61 = vadd.f32 %v1117_v20, %v1065_v23  ;;  %v1122_v49 = vadd.f32 %v1118_v55, %v1066_v14  ;;  %v1123_v7 = vadd.f32 %v1119_v56, %v1067_v13 }
  0xf7   : > { %v1154_v46 = vpop.permute.xlu1 %1153  ;;  %v1148_v8 = vadd.f32 %v1144_v44, %v1092_v28  ;;  %v1149_v2 = vadd.f32 %v1145_v26, %v1093_v34  ;;  %v1150_v3 = vadd.f32 %v1146_v4, %v1094_v62  ;;  %v1151_v51 = vadd.f32 %v1147_v24, %v1095_v60 }
  0xf8   : > { %v1172_v48 = vmul.f32 %v1159_v30, %v1154_v46  ;;  %v1173_v63 = vmul.f32 %v1163_v31, %v1154_v46  ;;  %v1174_v0 = vmul.f32 %v1167_v25, %v1154_v46  ;;  %v1175_v59 = vmul.f32 %v1171_v29, %v1154_v46 }
  0xf9   : > { %v1215_v33 = vrot.slane %v1903_v36, %v1665_v35  ;;  %v1219_v9 = vrot.slane %v1905_v16, %v1665_v35  ;;  %v1223_v27 = vrot.slane %v1907_v17, %v1665_v35  ;;  %v1227_v19 = vrot.slane %v1909_v15, %v1665_v35 }
  0xfa   : > { %v1176_v55 = vadd.f32 %v1172_v48, %v1120_v6  ;;  %v1177_v56 = vadd.f32 %v1173_v63, %v1121_v61  ;;  %v1178_v1 = vadd.f32 %v1174_v0, %v1122_v49  ;;  %v1179_v50 = vadd.f32 %v1175_v59, %v1123_v7 }
  0xfb   : > { %v1204_v47 = vadd.f32 %v1200_v52, %v1148_v8  ;;  %v1205_v16 = vadd.f32 %v1201_v5, %v1149_v2  ;;  %v1206_v43 = vadd.f32 %v1202_v10, %v1150_v3  ;;  %v1207_v54 = vadd.f32 %v1203_v53, %v1151_v51 }
  0xfc   : > { %v1210_v20 = vpop.permute.xlu1 %1209  ;;  %v1251_v12 = vsub.s32 %v1248_v18, %v2051_v11 }
  0xfd   : > { %v1228_v40 = vmul.f32 %v1215_v33, %v1210_v20  ;;  %v1229_v41 = vmul.f32 %v1219_v9, %v1210_v20  ;;  %v1230_v42 = vmul.f32 %v1223_v27, %v1210_v20  ;;  %v1231_v36 = vmul.f32 %v1227_v19, %v1210_v20 }
  0xff   : > { %v1232_v17 = vadd.f32 %v1228_v40, %v1176_v55  ;;  %v1233_v45 = vadd.f32 %v1229_v41, %v1177_v56  ;;  %v1234_v35 = vadd.f32 %v1230_v42, %v1178_v1  ;;  %v1235_v15 = vadd.f32 %v1231_v36, %v1179_v50 }
 0x101   : > { %v1236_v32 = vadd.f32 %v1232_v17, %v1204_v47  ;;  %v1237_v21 = vadd.f32 %v1233_v45, %v1205_v16  ;;  %v1238_v57 = vadd.f32 %v1234_v35, %v1206_v43  ;;  %v1239_v52 = vadd.f32 %v1235_v15, %v1207_v54 }
 0x103   : > { %v1244_v39 = vcombine.low %v1236_v32, %v1237_v21  ;;  %v1245_v5 = vcombine.low %v1238_v57, %v1239_v52 }
 0x105   : > { %v1252_v10 = vrot.slane %v1244_v39, %v1251_v12  ;;  %v1259_v53 = vrot.slane %v1245_v5, %v1251_v12 }
 0x107   : > { %v1260_v22 = vcombine.low %v1252_v10, %v1259_v53 }
 0x109   : > { %1262 = vst [vmem:[%s272_s23] sm:$0xff] %v1260_v22 }
 0x10a   : > { %1452 = shalt.err (!%p1449_p3)
}
 0x10b   : > { %s1453_s18 = scalar_lea.hbm %s1276_s13, 128  ;;  %s1457_s21 = scalar_lea.hbm %s2026_s7, 256 }
 0x10c   : > { %p1454_p4 = scmp.ne.s32.totalorder %s1276_s13, %s1453_s18  ;;  %p1458_p9 = scmp.lt.s32.totalorder %s1276_s13, %s2026_s7 }
 0x10d   : > { %p1459_p10 = scmp.lt.s32.totalorder %s1457_s21, %s1453_s18 }
 0x10e   : > { %p1455_p7 = pnand %p1454_p4, %p1597_p5 }
 0x10f   : > { %p1460_p11 = por %p1459_p10, %p1458_p9 }
 0x110   : > { %p1456_p8 = pneg %p1455_p7 }
 0x112   : > { %p1461_p12 = pnand %p1460_p11, %p1456_p8 }
 0x114   : > { %1464 = shalt.err (!%p1461_p12)
}
 0x115   : > { %1350 = dma.vmem_to_hbm [thread:$0]  (%p1597_p5), %s1279_s29, 128, %s1276_s13, %s1264_s14  }
 0x116 PF: > { %p1356_p13 = scmp.ge.s32.totalorder %s1499_s27, 2  ;;  %s1290_s8 = sand.u32 1, %s1487_s24  }
 0x117   : > { %s1291_s9 = scalar_lea.sflag [#allocation3], %s1290_s8 }
 0x118   : > { %p1353_p0 = pnand %p1356_p13, %p1601_p6 }
 0x11a   : > { %p1354_p1 = pneg %p1353_p0 }
 0x11c   : > { %1482 = dma.done.wait (%p1354_p1), %s1291_s9, 128  }
 0x11d   : > { %1484 = vsyncadd (%p1354_p1), %s1291_s9, 4294967168  ;;  %p17_p2 = scmp.ge.s32.totalorder %s1584_s30, 4   ;;  %s2052_s24 = smov %s1491_s25 }
 0x11e   : > { %s2053_s25 = smov %s1495_s26  ;;  %s2054_s26 = smov %s1595_s10 }
 0x11f   : > { %s2055_s27 = smov %s1584_s30  ;;  %19 = sbr.rel (!%p17_p2) target bundleno = 3 (0x3), region = 83 }
 0x124   :  { %1296 = vsyncpa [#allocation3], 1 }
 0x125   :  { %1298 = vsyncpa [#allocation3 + $0x1], 1 }

</bundles_post_ra>
